<compile_context>
chip_gen: v6e
topology: v6e:2x2x1
jax: 0.10.0
libtpu: 0.0.40
codegen_flags: <defaults>
</compile_context>

<pallas_src>
import functools

import jax
import jax.numpy as jnp
from jax.experimental import pallas as pl
from jax.experimental.pallas import tpu as pltpu


def _lap_kernel(wkv_ref, wout_ref, bout_ref, x_ref, out_ref, *, n_ctx, inner):
    rows, _ = x_ref.shape
    tb = rows // n_ctx

    # Single fused projection: [v | per-head logits replicated over dim_head lanes].
    kv = jnp.dot(x_ref[...], wkv_ref[...],
                 preferred_element_type=jnp.float32)              # (rows, 2*inner) f32
    # Row-group split; free relayout when n_ctx % 8 == 0 (sublane-tile aligned).
    kv = kv.reshape(tb, n_ctx, 2 * inner)
    v = kv[:, :, :inner]            # (tb, N, inner)   lane-aligned slice when inner%128==0
    sim = kv[:, :, inner:]          # (tb, N, inner)   score for head j//dim_head at lane j

    # Numerically-stable softmax over the context axis.  Values are identical within a
    # head's dim_head lane block, so per-lane reductions == per-head reductions.
    sim = sim - jnp.max(sim, axis=1, keepdims=True)
    p = jnp.exp(sim)
    denom = jnp.sum(p, axis=1)                                    # (tb, inner)
    pooled = jnp.sum(p * v, axis=1)                               # (tb, inner)
    pooled = pooled * pl.reciprocal(denom, approx=True)           # normalize after pooling

    out = jnp.dot(pooled, wout_ref[...], preferred_element_type=jnp.float32)
    out = out + bout_ref[...].astype(jnp.float32)                 # (tb, Dp) lane-dense
    out_ref[...] = out.astype(out_ref.dtype)


def _vmem_capacity_bytes():
    """Physical VMEM of the attached TPU generation (fallback: 64 MiB, the v7x size)."""
    try:
        info = pltpu.get_tpu_info()
        for attr in ("vmem_capacity_bytes", "vmem_bytes", "vmem_size_bytes"):
            val = getattr(info, attr, None)
            if val:
                return int(val)
    except Exception:
        pass
    return 64 * (1 << 20)


def _step_working_set_bytes(tb, n_ctx, d, d_pad, inner, x_itemsize):
    """Per-grid-step VMEM: double-buffered x/out blocks + f32 intermediates."""
    rows = tb * n_ctx
    xin = 2 * rows * d * x_itemsize
    out = 2 * tb * d_pad * x_itemsize
    inter = rows * (2 * inner) * 4        # kv (f32)
    inter += 2 * rows * inner * 4         # exp(sim) and p*v temporaries (f32)
    return xin + out + inter


def _pick_block_batch(B, n_ctx, d, d_pad, inner, x_itemsize, budget_bytes):
    """Largest legal block-batch whose per-step working set fits the budget.

    Legal == the (tb, d_pad) output block lowers cleanly: tb % 8 == 0 or tb == B.
    Prefers >= 2 grid steps (keeps both v7x TensorCores busy via the "parallel" batch
    axis — free on 1-TC chips) as long as the MXU M dimension (tb*n_ctx rows) stays
    reasonably filled.
    """
    valid = list(range(8, B + 1, 8))
    if B not in valid:
        valid.append(B)

    def fits(tb):
        return _step_working_set_bytes(tb, n_ctx, d, d_pad, inner, x_itemsize) <= budget_bytes

    cands = [tb for tb in valid if fits(tb)]
    if not cands:
        cands = [min(valid)]
    multi = [tb for tb in cands if pl.cdiv(B, tb) >= 2 and tb * n_ctx >= 256]
    return max(multi) if multi else max(cands)


def latent_attention_pooling(x, params, *, heads, dim_head, temperature=10.0,
                             block_batch=None, weight_buffers=1):
    """x: (B, N, D). Returns (B, D). Matches LatentAttentionPooling.forward (eval)."""
    B, N, D = x.shape
    inner = heads * dim_head
    scale = dim_head ** (-0.5)
    cdt = x.dtype
    itemsize = jnp.dtype(cdt).itemsize
    f32 = jnp.float32

    query, wq, wk, wv, wout, bout = (
        params["query"], params["wq"], params["wk"], params["wv"],
        params["wout"], params["bout"],
    )
    assert query.shape == (1, D)
    assert wq.shape == (D, inner) and wk.shape == (D, inner) and wv.shape == (D, inner)
    assert wout.shape == (inner, D) and bout.shape == (1, D)

    # ---- Batch-invariant weight prep (hoisted out of the kernel) --------------------
    # Fold the latent-query projection, softmax scale and 1/temperature into Wk, collapse
    # per head, then replicate each head column across its dim_head lanes so the kernel
    # gets per-head logits at full `inner` lane width from the same matmul as V:
    #   wk_qe[d, j] = sum_{j' in head(j)} Wk[d, j'] * (query @ Wq)[j'] * scale / temperature
    q_scaled = (query.astype(f32) @ wq.astype(f32)) * (scale / temperature)    # (1, inner)
    wk_q = (wk.astype(f32) * q_scaled).reshape(D, heads, dim_head).sum(-1)     # (D, heads)
    wk_qe = jnp.repeat(wk_q, dim_head, axis=1)                                 # (D, inner)
    wkv = jnp.concatenate([wv.astype(f32), wk_qe], axis=1).astype(cdt)         # (D, 2*inner)

    # Lane-dense output: pad the out projection to a multiple of 128 lanes, slice after.
    Dp = D if D % 128 == 0 else ((D + 127) // 128) * 128
    wout_p = wout.astype(f32)
    bout_p = bout.astype(f32)
    if Dp != D:
        wout_p = jnp.pad(wout_p, ((0, 0), (0, Dp - D)))
        bout_p = jnp.pad(bout_p, ((0, 0), (0, Dp - D)))
    wout_p = wout_p.astype(cdt)
    bout_p = bout_p.astype(cdt)

    x2d = x.reshape(B * N, D)   # lane/sublane-native kernel block; no in-kernel x reshape

    # ---- Generation-aware tiling / VMEM budgets --------------------------------------
    vmem_cap = _vmem_capacity_bytes()                       # 128 MiB v5e/v6e, 64 MiB v7x
    w_vmem = (D * 2 * inner + inner * Dp + Dp) * itemsize
    budget = max(2 * (1 << 20), vmem_cap // 6 - 2 * w_vmem)
    tb = block_batch or _pick_block_batch(B, N, D, Dp, inner, itemsize, budget)
    if tb != B and tb % 8 != 0:
        raise ValueError(f"block_batch must be a multiple of 8 or equal to B; got {tb} (B={B})")
    tb = min(tb, B)

    need = 2 * w_vmem + _step_working_set_bytes(tb, N, D, Dp, inner, itemsize)
    vmem_limit = int(min(0.75 * vmem_cap, max(32 * (1 << 20), 1.5 * need)))

    grid = (pl.cdiv(B, tb),)
    kernel = functools.partial(_lap_kernel, n_ctx=N, inner=inner)

    def build(wbuf):
        def wspec(shape):
            idx = lambda b: (0,) * len(shape)
            if wbuf is None:
                return pl.BlockSpec(shape, idx)
            # Grid-invariant weights: no double-buffering; freed VMEM buys a larger tb.
            return pl.BlockSpec(shape, idx, pipeline_mode=pl.Buffered(wbuf))

        return pl.pallas_call(
            kernel,
            out_shape=jax.ShapeDtypeStruct((B, Dp), cdt),
            grid_spec=pltpu.PrefetchScalarGridSpec(
                num_scalar_prefetch=0,
                grid=grid,
                in_specs=[
                    wspec((D, 2 * inner)),                        # fused [Wv | Wk·q] weights
                    wspec((inner, Dp)),                           # Wout (lane-padded)
                    wspec((1, Dp)),                               # bout (lane-padded)
                    pl.BlockSpec((tb * N, D), lambda b: (b, 0)),  # x rows for tb batches
                ],
                out_specs=pl.BlockSpec((tb, Dp), lambda b: (b, 0)),
            ),
            compiler_params=pltpu.CompilerParams(
                dimension_semantics=("parallel",),
                vmem_limit_bytes=vmem_limit,
            ),
        )

    args = (wkv, wout_p, bout_p, x2d)
    try:
        out = build(weight_buffers)(*args)
    except Exception:
        if weight_buffers is None:
            raise
        # Eager-path fallback: some JAX versions reject single-buffered BlockSpecs; a
        # genuine kernel error will simply re-raise from the default-buffered build.
        out = build(None)(*args)

    return out[:, :D] if Dp != D else out


def _reference(x, params, *, heads, dim_head, temperature=10.0):
    """Plain-JAX reference mirroring the PyTorch forward (eval, no mask)."""
    B, N, D = x.shape
    scale = dim_head ** (-0.5)
    q = params["query"] @ params["wq"]                       # (1, inner)
    k = x @ params["wk"]                                     # (B, N, inner)
    v = x @ params["wv"]
    qh = q.reshape(1, heads, dim_head)
    kh = k.reshape(B, N, heads, dim_head)
    vh = v.reshape(B, N, heads, dim_head)
    sim = jnp.einsum("qhd,bnhd->bhqn", qh, kh) * scale / temperature
    attn = jax.nn.softmax(sim, axis=-1)
    out = jnp.einsum("bhqn,bnhd->bqhd", attn, vh).reshape(B, 1, heads * dim_head)
    res = out @ params["wout"] + params["bout"][None]
    return res[:, 0, :]


def make_params(key, dim, heads, dim_head):
    inner = heads * dim_head
    ks = jax.random.split(key, 6)
    return {
        "query": jax.random.normal(ks[0], (1, dim), jnp.float32),
        "wq":   0.05 * jax.random.normal(ks[1], (dim, inner), jnp.float32),
        "wk":   0.05 * jax.random.normal(ks[2], (dim, inner), jnp.float32),
        "wv":   0.05 * jax.random.normal(ks[3], (dim, inner), jnp.float32),
        "wout": 0.05 * jax.random.normal(ks[4], (inner, dim), jnp.float32),
        "bout": 0.05 * jax.random.normal(ks[5], (1, dim), jnp.float32),
    }


if __name__ == "__main__":
    B, N, D = 2, 8, 32
    HEADS, DIM_HEAD = 4, 64

    root = jax.random.PRNGKey(0)
    kx, kp = jax.random.split(root)
    x = jax.random.normal(kx, (B, N, D), jnp.float32)
    params = make_params(kp, D, HEADS, DIM_HEAD)

    out = latent_attention_pooling(x, params, heads=HEADS, dim_head=DIM_HEAD)
    out = jax.block_until_ready(out)

    ref = _reference(x, params, heads=HEADS, dim_head=DIM_HEAD)
    assert out.shape == (B, D), out.shape
    max_err = float(jnp.max(jnp.abs(out - ref)))
    assert jnp.allclose(out, ref, atol=2e-3, rtol=2e-3), max_err

    print("KERNEL_OK")
</pallas_src>

<mosaic_0001>
module attributes {stable_mosaic.version = 11 : i64} {
  func.func @_lap_kernel(%arg0: i32, %arg1: memref<32x512xf32, #tpu.memory_space<vmem>>, %arg2: memref<256x128xf32, #tpu.memory_space<vmem>>, %arg3: memref<1x128xf32, #tpu.memory_space<vmem>>, %arg4: memref<16x32xf32, #tpu.memory_space<vmem>>, %arg5: memref<2x128xf32, #tpu.memory_space<vmem>>) attributes {dimension_semantics = [#tpu.dimension_semantics<parallel>], iteration_bounds = array<i64: 1>, scalar_prefetch = 0 : i64, scratch_operands = 0 : i64, tpu.core_type = #tpu.core_type<tc>, window_params = [{pipeline_mode = #tpu.pipeline_mode<synchronous>, transform_indices = @transform_0, window_bounds = array<i64: 32, 512>}, {pipeline_mode = #tpu.pipeline_mode<synchronous>, transform_indices = @transform_1, window_bounds = array<i64: 256, 128>}, {pipeline_mode = #tpu.pipeline_mode<synchronous>, transform_indices = @transform_2, window_bounds = array<i64: 1, 128>}, {transform_indices = @transform_3, window_bounds = array<i64: 16, 32>}, {transform_indices = @transform_4, window_bounds = array<i64: 2, 128>}]} {
    %c0 = arith.constant 0 : index
    %c0_0 = arith.constant 0 : index
    %0 = vector.load %arg4[%c0, %c0_0] : memref<16x32xf32, #tpu.memory_space<vmem>>, vector<16x32xf32>
    %c0_1 = arith.constant 0 : index
    %c0_2 = arith.constant 0 : index
    %1 = vector.load %arg1[%c0_1, %c0_2] : memref<32x512xf32, #tpu.memory_space<vmem>>, vector<32x512xf32>
    %cst = arith.constant dense<0.000000e+00> : vector<16x512xf32>
    %2 = tpu.matmul %0, %1, %cst {dimension_numbers = #tpu.dot_dimension_numbers<[1], [0], [0], [1], [0, 0, 1, 1], [], []>} : vector<16x32xf32>, vector<32x512xf32>, vector<16x512xf32> -> vector<16x512xf32>
    %3 = vector.shape_cast %2 : vector<16x512xf32> to vector<2x8x512xf32>
    %4 = vector.extract_strided_slice %3 {offsets = [0, 0, 0], sizes = [2, 8, 256], strides = [1, 1, 1]} : vector<2x8x512xf32> to vector<2x8x256xf32>
    %5 = vector.extract_strided_slice %3 {offsets = [0, 0, 256], sizes = [2, 8, 256], strides = [1, 1, 1]} : vector<2x8x512xf32> to vector<2x8x256xf32>
    %cst_3 = arith.constant dense<0xFF800000> : vector<2x256xf32>
    %6 = vector.multi_reduction <maximumf>, %5, %cst_3 [1] : vector<2x8x256xf32> to vector<2x256xf32>
    %7 = vector.shape_cast %6 : vector<2x256xf32> to vector<2x1x256xf32>
    %8 = vector.broadcast %7 : vector<2x1x256xf32> to vector<2x8x256xf32>
    %9 = arith.subf %5, %8 : vector<2x8x256xf32>
    %10 = math.exp %9 : vector<2x8x256xf32>
    %cst_4 = arith.constant dense<0.000000e+00> : vector<2x256xf32>
    %11 = vector.multi_reduction <add>, %10, %cst_4 [1] : vector<2x8x256xf32> to vector<2x256xf32>
    %12 = arith.mulf %10, %4 : vector<2x8x256xf32>
    %cst_5 = arith.constant dense<0.000000e+00> : vector<2x256xf32>
    %13 = vector.multi_reduction <add>, %12, %cst_5 [1] : vector<2x8x256xf32> to vector<2x256xf32>
    %14 = tpu.reciprocal %11 {approx = true} : vector<2x256xf32> -> vector<2x256xf32>
    %15 = arith.mulf %13, %14 : vector<2x256xf32>
    %c0_6 = arith.constant 0 : index
    %c0_7 = arith.constant 0 : index
    %16 = vector.load %arg2[%c0_6, %c0_7] : memref<256x128xf32, #tpu.memory_space<vmem>>, vector<256x128xf32>
    %cst_8 = arith.constant dense<0.000000e+00> : vector<2x128xf32>
    %17 = tpu.matmul %15, %16, %cst_8 {dimension_numbers = #tpu.dot_dimension_numbers<[1], [0], [0], [1], [0, 0, 1, 1], [], []>} : vector<2x256xf32>, vector<256x128xf32>, vector<2x128xf32> -> vector<2x128xf32>
    %c0_9 = arith.constant 0 : index
    %c0_10 = arith.constant 0 : index
    %18 = vector.load %arg3[%c0_9, %c0_10] : memref<1x128xf32, #tpu.memory_space<vmem>>, vector<1x128xf32>
    %19 = vector.broadcast %18 : vector<1x128xf32> to vector<2x128xf32>
    %20 = arith.addf %17, %19 : vector<2x128xf32>
    %c0_11 = arith.constant 0 : index
    %c0_12 = arith.constant 0 : index
    %21 = vector.load %arg5[%c0_11, %c0_12] : memref<2x128xf32, #tpu.memory_space<vmem>>, vector<2x128xf32>
    tpu.vector_store %arg5[%c0_11, %c0_12], %20 {strides = array<i32>} : memref<2x128xf32, #tpu.memory_space<vmem>>, vector<2x128xf32>,
    return
  }
  func.func @transform_0(%arg0: i32) -> (i32, i32) {
    %c0_i32 = arith.constant 0 : i32
    %c0_i32_0 = arith.constant 0 : i32
    %c0_i32_1 = arith.constant 0 : i32
    return %c0_i32, %c0_i32_0 : i32, i32
  }
  func.func @transform_1(%arg0: i32) -> (i32, i32) {
    %c0_i32 = arith.constant 0 : i32
    %c0_i32_0 = arith.constant 0 : i32
    %c0_i32_1 = arith.constant 0 : i32
    return %c0_i32, %c0_i32_0 : i32, i32
  }
  func.func @transform_2(%arg0: i32) -> (i32, i32) {
    %c0_i32 = arith.constant 0 : i32
    %c0_i32_0 = arith.constant 0 : i32
    %c0_i32_1 = arith.constant 0 : i32
    return %c0_i32, %c0_i32_0 : i32, i32
  }
  func.func @transform_3(%arg0: i32) -> (i32, i32) {
    %c0_i32 = arith.constant 0 : i32
    %c0_i32_0 = arith.constant 0 : i32
    return %arg0, %c0_i32 : i32, i32
  }
  func.func @transform_4(%arg0: i32) -> (i32, i32) {
    %c0_i32 = arith.constant 0 : i32
    %c0_i32_0 = arith.constant 0 : i32
    return %arg0, %c0_i32 : i32, i32
  }
}

module attributes {stable_mosaic.version = 11 : i64} {
  func.func @_lap_kernel(%arg0: i32, %arg1: memref<32x512xf32, #tpu.memory_space<vmem>>, %arg2: memref<256x128xf32, #tpu.memory_space<vmem>>, %arg3: memref<1x128xf32, #tpu.memory_space<vmem>>, %arg4: memref<16x32xf32, #tpu.memory_space<vmem>>, %arg5: memref<2x128xf32, #tpu.memory_space<vmem>>) attributes {dimension_semantics = [#tpu.dimension_semantics<parallel>], iteration_bounds = array<i64: 1>, scalar_prefetch = 0 : i64, scratch_operands = 0 : i64, tpu.core_type = #tpu.core_type<tc>, window_params = [{pipeline_mode = #tpu.pipeline_mode<synchronous>, transform_indices = @transform_0, window_bounds = array<i64: 32, 512>}, {pipeline_mode = #tpu.pipeline_mode<synchronous>, transform_indices = @transform_1, window_bounds = array<i64: 256, 128>}, {pipeline_mode = #tpu.pipeline_mode<synchronous>, transform_indices = @transform_2, window_bounds = array<i64: 1, 128>}, {transform_indices = @transform_3, window_bounds = array<i64: 16, 32>}, {transform_indices = @transform_4, window_bounds = array<i64: 2, 128>}]} {
    %c0 = arith.constant 0 : index
    %c0_0 = arith.constant 0 : index
    %0 = vector.load %arg4[%c0, %c0_0] : memref<16x32xf32, #tpu.memory_space<vmem>>, vector<16x32xf32>
    %c0_1 = arith.constant 0 : index
    %c0_2 = arith.constant 0 : index
    %1 = vector.load %arg1[%c0_1, %c0_2] : memref<32x512xf32, #tpu.memory_space<vmem>>, vector<32x512xf32>
    %cst = arith.constant dense<0.000000e+00> : vector<16x512xf32>
    %2 = tpu.matmul %0, %1, %cst {dimension_numbers = #tpu.dot_dimension_numbers<[1], [0], [0], [1], [0, 0, 1, 1], [], []>} : vector<16x32xf32>, vector<32x512xf32>, vector<16x512xf32> -> vector<16x512xf32>
    %3 = vector.shape_cast %2 : vector<16x512xf32> to vector<2x8x512xf32>
    %4 = vector.extract_strided_slice %3 {offsets = [0, 0, 0], sizes = [2, 8, 256], strides = [1, 1, 1]} : vector<2x8x512xf32> to vector<2x8x256xf32>
    %5 = vector.extract_strided_slice %3 {offsets = [0, 0, 256], sizes = [2, 8, 256], strides = [1, 1, 1]} : vector<2x8x512xf32> to vector<2x8x256xf32>
    %cst_3 = arith.constant dense<0xFF800000> : vector<2x256xf32>
    %6 = vector.multi_reduction <maximumf>, %5, %cst_3 [1] : vector<2x8x256xf32> to vector<2x256xf32>
    %7 = vector.shape_cast %6 : vector<2x256xf32> to vector<2x1x256xf32>
    %8 = vector.broadcast %7 : vector<2x1x256xf32> to vector<2x8x256xf32>
    %9 = arith.subf %5, %8 : vector<2x8x256xf32>
    %10 = math.exp %9 : vector<2x8x256xf32>
    %cst_4 = arith.constant dense<0.000000e+00> : vector<2x256xf32>
    %11 = vector.multi_reduction <add>, %10, %cst_4 [1] : vector<2x8x256xf32> to vector<2x256xf32>
    %12 = arith.mulf %10, %4 : vector<2x8x256xf32>
    %cst_5 = arith.constant dense<0.000000e+00> : vector<2x256xf32>
    %13 = vector.multi_reduction <add>, %12, %cst_5 [1] : vector<2x8x256xf32> to vector<2x256xf32>
    %14 = tpu.reciprocal %11 {approx = true} : vector<2x256xf32> -> vector<2x256xf32>
    %15 = arith.mulf %13, %14 : vector<2x256xf32>
    %c0_6 = arith.constant 0 : index
    %c0_7 = arith.constant 0 : index
    %16 = vector.load %arg2[%c0_6, %c0_7] : memref<256x128xf32, #tpu.memory_space<vmem>>, vector<256x128xf32>
    %cst_8 = arith.constant dense<0.000000e+00> : vector<2x128xf32>
    %17 = tpu.matmul %15, %16, %cst_8 {dimension_numbers = #tpu.dot_dimension_numbers<[1], [0], [0], [1], [0, 0, 1, 1], [], []>} : vector<2x256xf32>, vector<256x128xf32>, vector<2x128xf32> -> vector<2x128xf32>
    %c0_9 = arith.constant 0 : index
    %c0_10 = arith.constant 0 : index
    %18 = vector.load %arg3[%c0_9, %c0_10] : memref<1x128xf32, #tpu.memory_space<vmem>>, vector<1x128xf32>
    %19 = vector.broadcast %18 : vector<1x128xf32> to vector<2x128xf32>
    %20 = arith.addf %17, %19 : vector<2x128xf32>
    %c0_11 = arith.constant 0 : index
    %c0_12 = arith.constant 0 : index
    %21 = vector.load %arg5[%c0_11, %c0_12] : memref<2x128xf32, #tpu.memory_space<vmem>>, vector<2x128xf32>
    tpu.vector_store %arg5[%c0_11, %c0_12], %20 {strides = array<i32>} : memref<2x128xf32, #tpu.memory_space<vmem>>, vector<2x128xf32>,
    return
  }
  func.func @transform_0(%arg0: i32) -> (i32, i32) {
    %c0_i32 = arith.constant 0 : i32
    %c0_i32_0 = arith.constant 0 : i32
    %c0_i32_1 = arith.constant 0 : i32
    return %c0_i32, %c0_i32_0 : i32, i32
  }
  func.func @transform_1(%arg0: i32) -> (i32, i32) {
    %c0_i32 = arith.constant 0 : i32
    %c0_i32_0 = arith.constant 0 : i32
    %c0_i32_1 = arith.constant 0 : i32
    return %c0_i32, %c0_i32_0 : i32, i32
  }
  func.func @transform_2(%arg0: i32) -> (i32, i32) {
    %c0_i32 = arith.constant 0 : i32
    %c0_i32_0 = arith.constant 0 : i32
    %c0_i32_1 = arith.constant 0 : i32
    return %c0_i32, %c0_i32_0 : i32, i32
  }
  func.func @transform_3(%arg0: i32) -> (i32, i32) {
    %c0_i32 = arith.constant 0 : i32
    %c0_i32_0 = arith.constant 0 : i32
    return %arg0, %c0_i32 : i32, i32
  }
  func.func @transform_4(%arg0: i32) -> (i32, i32) {
    %c0_i32 = arith.constant 0 : i32
    %c0_i32_0 = arith.constant 0 : i32
    return %arg0, %c0_i32 : i32, i32
  }
}

</mosaic_0001>

<bundles_post_ra>
// kernel: tpu_custom_call.1
= control target key start
LH: loop header
LB: loop body
LE: loop exit
PB: predicated region body
PF: predicated region fallthrough
CT: control target
= control target key end

     0   :  { %9 = vsyncpa [#allocation3], 0  ;;  %s673_s0 = inlined_call_operand.hbm [shape: f32[32,512], index: 0, kind: input, shape index: {}]   ;;  %s674_s1 = inlined_call_operand.hbm [shape: f32[256,128], index: 1, kind: input, shape index: {}]   ;;  %s675_s2 = inlined_call_operand.vmem [shape: f32[1,128], index: 2, kind: input, shape index: {}]   ;;  %s676_s3 = inlined_call_operand.hbm [shape: f32[16,32], index: 3, kind: input, shape index: {}]   ;;  %s677_s4 = inlined_call_operand.hbm [shape: f32[2,128], index: 4, kind: output, shape index: {}]  }
   0x1   :  { %10 = vsyncpa [#allocation6], 0 }
   0x2   :  { %11 = vsyncpa [#allocation4], 0  ;;  %s620_s15 = smov [#allocation5]  }
   0x3   :  { %s29_s16 = sshll.u32 %s620_s15, 4  ;;  %s30_s16 = int_to_ptr.vmem [resolvable:$true] %s29_s16 }
   0x4   :  { %s542_s17 = scalar_lea.vmem %s30_s16, 4096  ;;  %p547_p1 = scmp.lt.s32.totalorder %s30_s16, %s30_s16 }
   0x5   :  { %p543_p0 = scmp.ne.s32.totalorder %s30_s16, %s542_s17  ;;  %p548_p2 = scmp.lt.s32.totalorder %s542_s17, %s542_s17 }
   0x7   :  { %p549_p3 = por %p548_p2, %p547_p1 }
   0x9   :  { %p550_p4 = pnand %p549_p3, %p543_p0 }
   0xb   :  { %553 = shalt.err (!%p550_p4)
}
   0xc   :  { %s621_s18 = smov 128   ;;  %s622_s19 = smov 8  }
   0xd   :  { %35 = dma.hbm_to_vmem [thread:$0]  %s674_s1, 4096, %s30_s16, [#allocation6], %s621_s18, %s621_s18, %s622_s19  }
   0xe   :  { %s623_s22 = smov [#allocation2]  }
   0xf   :  { %s17_s23 = sshll.u32 %s623_s22, 4  ;;  %s18_s23 = int_to_ptr.vmem [resolvable:$true] %s17_s23 }
  0x10   :  { %s562_s24 = scalar_lea.vmem %s18_s23, 2048  ;;  %p567_p6 = scmp.lt.s32.totalorder %s18_s23, %s18_s23 }
  0x11   :  { %p563_p5 = scmp.ne.s32.totalorder %s18_s23, %s562_s24  ;;  %p568_p7 = scmp.lt.s32.totalorder %s562_s24, %s562_s24 }
  0x13   :  { %p569_p8 = por %p568_p7, %p567_p6 }
  0x15   :  { %p570_p9 = pnand %p569_p8, %p563_p5 }
  0x17   :  { %573 = shalt.err (!%p570_p9)
}
  0x18   :  { %s624_s25 = smov 512   ;;  %s625_s26 = smov 32  }
  0x19   :  { %23 = dma.hbm_to_vmem [thread:$0]  %s673_s0, 2048, %s18_s23, [#allocation3], %s624_s25, %s624_s25, %s625_s26  }
  0x1a   :  { %s626_s29 = smov [#allocation7]  }
  0x1b   :  { %s43_s30 = sshll.u32 %s626_s29, 4  ;;  %s44_s30 = int_to_ptr.vmem [resolvable:$true] %s43_s30 }
  0x1c   :  { %s582_s1 = scalar_lea.vmem %s44_s30, 256  ;;  %p587_p11 = scmp.lt.s32.totalorder %s44_s30, %s44_s30 }
  0x1d   :  { %p583_p10 = scmp.ne.s32.totalorder %s44_s30, %s582_s1  ;;  %p588_p12 = scmp.lt.s32.totalorder %s582_s1, %s582_s1 }
  0x1f   :  { %p589_p13 = por %p588_p12, %p587_p11 }
  0x21   :  { %p590_p0 = pnand %p589_p13, %p583_p10 }
  0x23   :  { %593 = shalt.err (!%p590_p0)
}
  0x24   :  { %49 = dma.hbm_to_vmem [thread:$0]  %s676_s3, 256, %s44_s30, [#allocation6], %s621_s18, %s621_s18, %s622_s19  }
  0x25   :  { %614 = dma.done.wait [#allocation3], 2048  }
  0x26   :  { %615 = vsyncadd [#allocation3], 4294965248 }
  0x27   :  { %616 = dma.done.wait [#allocation6], 4352  }
  0x28   :  { %617 = vsyncadd [#allocation6], 4294962944  ;;  %v627_v0 = vmov 0.0   ;;  %v74_v1 = vld [vmem:[#allocation2 + $0x68] sm:$0xff]  ;;  %v73_v2 = vld [vmem:[#allocation2 + $0x60] sm:$0xff]  ;;  %vm77_vm0 = vcmask 261120  }
  0x29   :  { %148 = vmatprep.mubr.f32.mxu1 %v627_v0  ;;  %v70_v3 = vld [vmem:[#allocation2 + $0x48] sm:$0xff]  ;;  %108 = vmatprep.subr.mxu1 %v74_v1  ;;  %v69_v4 = vld [vmem:[#allocation2 + $0x40] sm:$0xff]  ;;  %v76_v10 = vld [vmem:[#allocation2 + $0x78] sm:$0xff]  ;;  %vm377_vm1 = vcmask 1041409   ;;  %s628_s7 = smov [#allocation8]  }
  0x2a   :  { %109 = vmatpush1.msra.mxu1 %v73_v2  ;;  %v66_v5 = vld [vmem:[#allocation2 + $0x28] sm:$0xff]  ;;  %v65_v6 = vld [vmem:[#allocation2 + $0x20] sm:$0xff]  ;;  %v75_v11 = vld [vmem:[#allocation2 + $0x70] sm:$0xff]  ;;  %s459_s8 = sshll.u32 %s628_s7, 4  ;;  %s460_s8 = int_to_ptr.vmem [resolvable:$true] %s459_s8 }
  0x2b   :  { %110 = vmatprep.subr.mxu1 %v70_v3  ;;  %v62_v7 = vld [vmem:[#allocation2 + $0x8] sm:$0xff]  ;;  %v61_v8 = vld [vmem:[#allocation2] sm:$0xff]  ;;  %v72_v12 = vld [vmem:[#allocation2 + $0x58] sm:$0xff]  ;;  %s594_s9 = scalar_lea.vmem %s460_s8, 32  ;;  %p599_p2 = scmp.lt.s32.totalorder %s460_s8, %s460_s8 }
  0x2c   :  { %111 = vmatpush1.msra.mxu1 %v69_v4  ;;  %v59_v9 = vld [vmem:[#allocation7] sm:$0xff]  ;;  %v71_v13 = vld [vmem:[#allocation2 + $0x50] sm:$0xff]  ;;  %v60_v14 = vld [vmem:[#allocation7 + $0x8] sm:$0xff]  ;;  %p595_p1 = scmp.ne.s32.totalorder %s460_s8, %s594_s9  ;;  %p600_p3 = scmp.lt.s32.totalorder %s594_s9, %s594_s9 }
  0x2d   :  { %112 = vmatprep.subr.mxu1 %v66_v5  ;;  %v68_v15 = vld [vmem:[#allocation2 + $0x38] sm:$0xff]  ;;  %v67_v16 = vld [vmem:[#allocation2 + $0x30] sm:$0xff]  ;;  %v363_v23 = vld [vmem:[#allocation5 + $0xe8] sm:$0xff] }
  0x2e   :  { %113 = vmatpush1.msra.mxu1 %v65_v6  ;;  %v64_v17 = vld [vmem:[#allocation2 + $0x18] sm:$0xff]  ;;  %v63_v18 = vld [vmem:[#allocation2 + $0x10] sm:$0xff]  ;;  %v347_v24 = vld [vmem:[#allocation5 + $0x68] sm:$0xff]  ;;  %p601_p4 = por %p600_p3, %p599_p2 }
  0x2f   :  { %114 = vmatprep.subr.mxu1 %v62_v7  ;;  %v365_v19 = vld [vmem:[#allocation5 + $0xf8] sm:$0xff]  ;;  %v364_v21 = vld [vmem:[#allocation5 + $0xf0] sm:$0xff]  ;;  %v362_v25 = vld [vmem:[#allocation5 + $0xe0] sm:$0xff] }
  0x30   :  { %115 = vmatpush1.msra.mxu1 %v61_v8  ;;  %v349_v20 = vld [vmem:[#allocation5 + $0x78] sm:$0xff]  ;;  %474 = vmatprep.subr.mxu0 %v365_v19  ;;  %v348_v22 = vld [vmem:[#allocation5 + $0x70] sm:$0xff]  ;;  %v346_v26 = vld [vmem:[#allocation5 + $0x60] sm:$0xff]  ;;  %p602_p5 = pnand %p601_p4, %p595_p1 }
  0x31   :  { %469 = vmatmul.mubr.msk.f32.vlgmr.msra.gmra.mxu1 %vm77_vm0, %v59_v9  ;;  %185 = vmatprep.subr.mxu1 %v76_v10  ;;  %v361_v27 = vld [vmem:[#allocation5 + $0xd8] sm:$0xff]  ;;  %v360_v29 = vld [vmem:[#allocation5 + $0xd0] sm:$0xff]  ;;  %v359_v31 = vld [vmem:[#allocation5 + $0xc8] sm:$0xff] }
  0x32   :  { %186 = vmatpush1.msra.mxu1 %v75_v11  ;;  %154 = vmatprep.mubr.f32.mxu1 %v627_v0  ;;  %v345_v28 = vld [vmem:[#allocation5 + $0x58] sm:$0xff]  ;;  %v344_v30 = vld [vmem:[#allocation5 + $0x50] sm:$0xff]  ;;  %v343_v32 = vld [vmem:[#allocation5 + $0x48] sm:$0xff] }
  0x33   :  { %187 = vmatprep.subr.mxu1 %v72_v12  ;;  %475 = vmatpush3.msra.mxu0 %v349_v20  ;;  %v358_v33 = vld [vmem:[#allocation5 + $0xc0] sm:$0xff]  ;;  %v357_v35 = vld [vmem:[#allocation5 + $0xb8] sm:$0xff]  ;;  %v356_v37 = vld [vmem:[#allocation5 + $0xb0] sm:$0xff] }
  0x34   :  { %188 = vmatpush1.msra.mxu1 %v71_v13  ;;  %476 = vmatprep.subr.mxu0 %v364_v21  ;;  %v342_v34 = vld [vmem:[#allocation5 + $0x40] sm:$0xff]  ;;  %v341_v36 = vld [vmem:[#allocation5 + $0x38] sm:$0xff]  ;;  %v340_v38 = vld [vmem:[#allocation5 + $0x30] sm:$0xff] }
  0x35   :  { %470 = vmatmul.mubr.msk.f32.gmra.mxu1 %vm77_vm0, %v60_v14  ;;  %189 = vmatprep.subr.mxu1 %v68_v15  ;;  %v355_v39 = vld [vmem:[#allocation5 + $0xa8] sm:$0xff]  ;;  %v354_v41 = vld [vmem:[#allocation5 + $0xa0] sm:$0xff]  ;;  %v353_v43 = vld [vmem:[#allocation5 + $0x98] sm:$0xff] }
  0x36   :  { %190 = vmatpush1.msra.mxu1 %v67_v16  ;;  %225 = vmatprep.mubr.f32.mxu1 %v627_v0  ;;  %v339_v40 = vld [vmem:[#allocation5 + $0x28] sm:$0xff]  ;;  %v338_v42 = vld [vmem:[#allocation5 + $0x20] sm:$0xff]  ;;  %v337_v44 = vld [vmem:[#allocation5 + $0x18] sm:$0xff] }
  0x37   :  { %191 = vmatprep.subr.mxu1 %v64_v17  ;;  %477 = vmatpush3.msra.mxu0 %v348_v22  ;;  %v352_v45 = vld [vmem:[#allocation5 + $0x90] sm:$0xff]  ;;  %v351_v47 = vld [vmem:[#allocation5 + $0x88] sm:$0xff]  ;;  %v350_v49 = vld [vmem:[#allocation5 + $0x80] sm:$0xff] }
  0x38   :  { %192 = vmatpush1.msra.mxu1 %v63_v18  ;;  %478 = vmatprep.subr.mxu0 %v363_v23  ;;  %v336_v46 = vld [vmem:[#allocation5 + $0x10] sm:$0xff]  ;;  %v335_v48 = vld [vmem:[#allocation5 + $0x8] sm:$0xff]  ;;  %v334_v50 = vld [vmem:[#allocation5] sm:$0xff] }
  0x39   :  { %471 = vmatmul.mubr.msk.f32.vlgmr.msra.gmra.mxu1 %vm77_vm0, %v59_v9  ;;  %479 = vmatpush3.msra.mxu0 %v347_v24 }
  0x3a   :  { %231 = vmatprep.mubr.f32.mxu1 %v627_v0  ;;  %480 = vmatprep.subr.mxu0 %v362_v25 }
  0x3b   :  { %481 = vmatpush3.msra.mxu0 %v346_v26 }
  0x3c   :  { %482 = vmatprep.subr.mxu0 %v361_v27 }
  0x3d   :  { %472 = vmatmul.mubr.msk.f32.gmra.mxu1 %vm77_vm0, %v60_v14  ;;  %483 = vmatpush3.msra.mxu0 %v345_v28 }
  0x3e   :  { %484 = vmatprep.subr.mxu0 %v360_v29 }
  0x3f   :  { %485 = vmatpush3.msra.mxu0 %v344_v30 }
  0x40   :  { %486 = vmatprep.subr.mxu0 %v359_v31 }
  0x41   :  { %487 = vmatpush3.msra.mxu0 %v343_v32 }
  0x42   :  { %488 = vmatprep.subr.mxu0 %v358_v33 }
  0x43   :  { %489 = vmatpush3.msra.mxu0 %v342_v34 }
  0x44   :  { %490 = vmatprep.subr.mxu0 %v357_v35 }
  0x45   :  { %491 = vmatpush3.msra.mxu0 %v341_v36 }
  0x46   :  { %492 = vmatprep.subr.mxu0 %v356_v37 }
  0x47   :  { %493 = vmatpush3.msra.mxu0 %v340_v38 }
  0x48   :  { %494 = vmatprep.subr.mxu0 %v355_v39 }
  0x49   :  { %495 = vmatpush3.msra.mxu0 %v339_v40 }
  0x4a   :  { %496 = vmatprep.subr.mxu0 %v354_v41 }
  0x4b   :  { %497 = vmatpush3.msra.mxu0 %v338_v42 }
  0x4c   :  { %498 = vmatprep.subr.mxu0 %v353_v43 }
  0x4d   :  { %499 = vmatpush3.msra.mxu0 %v337_v44 }
  0x4e   :  { %500 = vmatprep.subr.mxu0 %v352_v45 }
  0x4f   :  { %501 = vmatpush3.msra.mxu0 %v336_v46 }
  0x50   :  { %502 = vmatprep.subr.mxu0 %v351_v47 }
  0x51   :  { %503 = vmatpush3.msra.mxu0 %v335_v48 }
  0x52   :  { %504 = vmatprep.subr.mxu0 %v350_v49 }
  0x53   :  { %505 = vmatpush3.msra.mxu0 %v334_v50 }
  0xf1   :  { %v150_v51 = vpop.f32.mrf.mxu1 }
  0xf3   :  { %v152_v52 = vpop.f32.mrf.mxu1 }
  0xf5   :  { %v156_v53 = vpop.f32.mrf.mxu1 }
  0xf7   :  { %v158_v54 = vpop.f32.mrf.mxu1 }
  0xf9   :  { %v227_v55 = vpop.f32.mrf.mxu1 }
  0xfa   :  { %v238_v56 = vrot.slane %v227_v55, 4 }
  0xfb   :  { %v229_v57 = vpop.f32.mrf.mxu1 }
  0xfc   :  { %v239_v58 = vmax.f32 %v227_v55, %v238_v56  ;;  %v244_v59 = vrot.slane %v229_v57, 4 }
  0xfd   :  { %v233_v60 = vpop.f32.mrf.mxu1 }
  0xfe   :  { %v240_v61 = vrot.slane %v239_v58, 2  ;;  %v245_v62 = vmax.f32 %v229_v57, %v244_v59  ;;  %v250_v63 = vrot.slane %v233_v60, 4 }
  0xff   :  { %v235_v0 = vpop.f32.mrf.mxu1 }
 0x100   :  { %v241_v1 = vmax.f32 %v239_v58, %v240_v61  ;;  %v246_v2 = vrot.slane %v245_v62, 2  ;;  %v251_v3 = vmax.f32 %v233_v60, %v250_v63  ;;  %v256_v4 = vrot.slane %v235_v0, 4 }
 0x102   :  { %v242_v5 = vrot.slane %v241_v1, 1  ;;  %v247_v6 = vmax.f32 %v245_v62, %v246_v2  ;;  %v252_v7 = vrot.slane %v251_v3, 2  ;;  %v257_v8 = vmax.f32 %v235_v0, %v256_v4 }
 0x104   :  { %v243_v9 = vmax.f32 %v241_v1, %v242_v5  ;;  %v248_v10 = vrot.slane %v247_v6, 1  ;;  %v253_v11 = vmax.f32 %v251_v3, %v252_v7  ;;  %v258_v12 = vrot.slane %v257_v8, 2 }
 0x106   :  { %v262_v13 = vsub.f32 %v227_v55, %v243_v9  ;;  %v249_v14 = vmax.f32 %v247_v6, %v248_v10  ;;  %v254_v15 = vrot.slane %v253_v11, 1  ;;  %v259_v16 = vmax.f32 %v257_v8, %v258_v12 }
 0x108   :  { %v266_v17 = vmul.f32 1.442695, %v262_v13  ;;  %v263_v18 = vsub.f32 %v229_v57, %v249_v14  ;;  %v255_v19 = vmax.f32 %v253_v11, %v254_v15  ;;  %v260_v20 = vrot.slane %v259_v16, 1 }
 0x10a   :  { %518 = vpow2.f32 %v266_v17  ;;  %v268_v21 = vmul.f32 1.442695, %v263_v18  ;;  %v264_v22 = vsub.f32 %v233_v60, %v255_v19  ;;  %v261_v23 = vmax.f32 %v259_v16, %v260_v20 }
 0x10c   :  { %520 = vpow2.f32 %v268_v21  ;;  %v270_v24 = vmul.f32 1.442695, %v264_v22  ;;  %v265_v25 = vsub.f32 %v235_v0, %v261_v23 }
 0x10e   :  { %522 = vpow2.f32 %v270_v24  ;;  %v272_v26 = vmul.f32 1.442695, %v265_v25 }
 0x110   :  { %524 = vpow2.f32 %v272_v26 }
 0x117   :  { %v519_v27 = vpop.eup %518 }
 0x118   :  { %v274_v28 = vrot.slane %v519_v27, 4  ;;  %v298_v44 = vmul.f32 %v519_v27, %v150_v51 }
 0x119   :  { %v521_v29 = vpop.eup %520 }
 0x11a   :  { %v280_v30 = vrot.slane %v521_v29, 4  ;;  %v275_v31 = vadd.f32 %v519_v27, %v274_v28  ;;  %v299_v40 = vmul.f32 %v521_v29, %v152_v52  ;;  %v302_v60 = vrot.slane %v298_v44, 4 }
 0x11b   :  { %v523_v32 = vpop.eup %522 }
 0x11c   :  { %v281_v33 = vadd.f32 %v521_v29, %v280_v30  ;;  %v276_v34 = vrot.slane %v275_v31, 2  ;;  %v286_v35 = vrot.slane %v523_v32, 4  ;;  %v300_v37 = vmul.f32 %v523_v32, %v156_v53  ;;  %v473_v30 = vld [vmem:[%s675_s2] ss:$0 sm:$0xff] }
 0x11d   :  { %v525_v36 = vpop.eup %524  ;;  %v308_v56 = vrot.slane %v299_v40, 4  ;;  %v303_v1 = vadd.f32 %v302_v60, %v298_v44 }
 0x11e   :  { %v282_v38 = vrot.slane %v281_v33, 2  ;;  %v292_v39 = vrot.slane %v525_v36, 4  ;;  %v301_v41 = vmul.f32 %v525_v36, %v158_v54  ;;  %v277_v42 = vadd.f32 %v276_v34, %v275_v31 }
 0x11f   :  { %v287_v43 = vadd.f32 %v523_v32, %v286_v35  ;;  %v314_v49 = vrot.slane %v300_v37, 4  ;;  %v309_v63 = vadd.f32 %v308_v56, %v299_v40  ;;  %v304_v6 = vrot.slane %v303_v1, 2 }
 0x120   :  { %v283_v45 = vadd.f32 %v282_v38, %v281_v33  ;;  %v293_v46 = vadd.f32 %v525_v36, %v292_v39  ;;  %v278_v47 = vrot.slane %v277_v42, 1  ;;  %v320_v57 = vrot.slane %v301_v41, 4 }
 0x121   :  { %v288_v48 = vrot.slane %v287_v43, 2  ;;  %v315_v52 = vadd.f32 %v314_v49, %v300_v37  ;;  %v310_v4 = vrot.slane %v309_v63, 2  ;;  %v305_v10 = vadd.f32 %v304_v6, %v303_v1 }
 0x122   :  { %v284_v50 = vrot.slane %v283_v45, 1  ;;  %v294_v55 = vrot.slane %v293_v46, 2  ;;  %v279_v58 = vadd.f32 %v278_v47, %v277_v42  ;;  %v321_v0 = vadd.f32 %v320_v57, %v301_v41 }
 0x123   :  { %v289_v59 = vadd.f32 %v288_v48, %v287_v43  ;;  %v316_v3 = vrot.slane %v315_v52, 2  ;;  %v311_v8 = vadd.f32 %v310_v4, %v309_v63  ;;  %v306_v14 = vrot.slane %v305_v10, 1 }
 0x124   :  { %v285_v53 = vadd.f32 %v284_v50, %v283_v45  ;;  %v295_v61 = vadd.f32 %v294_v55, %v293_v46  ;;  %526 = vrcp.f32 %v279_v58  ;;  %v322_v5 = vrot.slane %v321_v0, 2 }
 0x125   :  { %v290_v62 = vrot.slane %v289_v59, 1  ;;  %v317_v7 = vadd.f32 %v316_v3, %v315_v52  ;;  %v312_v12 = vrot.slane %v311_v8, 1  ;;  %v307_v22 = vadd.f32 %v306_v14, %v305_v10 }
 0x126   :  { %v296_v54 = vrot.slane %v295_v61, 1  ;;  %528 = vrcp.f32 %v285_v53  ;;  %v323_v9 = vadd.f32 %v322_v5, %v321_v0 }
 0x127   :  { %v291_v51 = vadd.f32 %v290_v62, %v289_v59  ;;  %v318_v11 = vrot.slane %v317_v7, 1  ;;  %v313_v19 = vadd.f32 %v312_v12, %v311_v8 }
 0x128   :  { %v297_v2 = vadd.f32 %v296_v54, %v295_v61  ;;  %v324_v13 = vrot.slane %v323_v9, 1 }
 0x129   :  { %530 = vrcp.f32 %v291_v51  ;;  %v319_v17 = vadd.f32 %v318_v11, %v317_v7 }
 0x12a   :  { %532 = vrcp.f32 %v297_v2  ;;  %v325_v20 = vadd.f32 %v324_v13, %v323_v9 }
 0x131   :  { %v527_v15 = vpop.eup %526 }
 0x132   :  { %v330_v26 = vmul.f32 %v527_v15, %v307_v22 }
 0x133   :  { %v529_v16 = vpop.eup %528 }
 0x134   :  { %v331_v24 = vmul.f32 %v529_v16, %v313_v19 }
 0x136   :  { %v531_v18 = vpop.eup %530 }
 0x137   :  { %v533_v21 = vpop.eup %532  ;;  %v332_v23 = vmul.f32 %v531_v18, %v319_v17 }
 0x138   :  { %v333_v25 = vmul.f32 %v533_v21, %v325_v20 }
 0x139   :  { %v378_v28 = vsel %vm377_vm1, %v332_v23, %v330_v26 }
 0x13a   :  { %v379_v27 = vsel %vm377_vm1, %v333_v25, %v331_v24 }
 0x13b   :  { %446 = vmatprep.mubr.f32.mxu0 %v379_v27 }
 0x13c   :  { %447 = vmatmul.mubr.f32.vlgmr.msra.gmra.mxu0 %v378_v28 }
 0x1fc   :  { %v506_v29 = vpop.f32.mrf.mxu0 }
 0x1fe   :  { %v507_v31 = vpop.f32.mrf.mxu0 }
 0x1ff   :  { %v508_v32 = vadd.f32 %v507_v31, %v506_v29 }
 0x201   :  { %v449_v33 = vadd.f32 %v508_v32, %v473_v30 }
 0x203   :  { %452 = vst [vmem:[#allocation8] sm:$0x3] %v449_v33 }
 0x204   :  { %605 = shalt.err (!%p602_p5)
}
 0x205   :  { %462 = dma.vmem_to_hbm [thread:$0]  %s460_s8, 32, %s677_s4, [#allocation4]  }
 0x206   :  { %618 = dma.done.wait [#allocation4], 32  }
 0x207   :  { %619 = vsyncadd [#allocation4], 4294967264 }
 0x208   :  { %466 = vsyncpa [#allocation3], 1 }
 0x209   :  { %467 = vsyncpa [#allocation6], 1 }
 0x20a   :  { %468 = vsyncpa [#allocation4], 1 }

// kernel: tpu_custom_call.1
= control target key start
LH: loop header
LB: loop body
LE: loop exit
PB: predicated region body
PF: predicated region fallthrough
CT: control target
= control target key end

     0   :  { %9 = vsyncpa [#allocation3], 0  ;;  %s673_s0 = inlined_call_operand.hbm [shape: f32[32,512], index: 0, kind: input, shape index: {}]   ;;  %s674_s1 = inlined_call_operand.hbm [shape: f32[256,128], index: 1, kind: input, shape index: {}]   ;;  %s675_s2 = inlined_call_operand.vmem [shape: f32[1,128], index: 2, kind: input, shape index: {}]   ;;  %s676_s3 = inlined_call_operand.hbm [shape: f32[16,32], index: 3, kind: input, shape index: {}]   ;;  %s677_s4 = inlined_call_operand.hbm [shape: f32[2,128], index: 4, kind: output, shape index: {}]  }
   0x1   :  { %10 = vsyncpa [#allocation6], 0 }
   0x2   :  { %11 = vsyncpa [#allocation4], 0  ;;  %s620_s15 = smov [#allocation5]  }
   0x3   :  { %s29_s16 = sshll.u32 %s620_s15, 4  ;;  %s30_s16 = int_to_ptr.vmem [resolvable:$true] %s29_s16 }
   0x4   :  { %s542_s17 = scalar_lea.vmem %s30_s16, 4096  ;;  %p547_p1 = scmp.lt.s32.totalorder %s30_s16, %s30_s16 }
   0x5   :  { %p543_p0 = scmp.ne.s32.totalorder %s30_s16, %s542_s17  ;;  %p548_p2 = scmp.lt.s32.totalorder %s542_s17, %s542_s17 }
   0x7   :  { %p549_p3 = por %p548_p2, %p547_p1 }
   0x9   :  { %p550_p4 = pnand %p549_p3, %p543_p0 }
   0xb   :  { %553 = shalt.err (!%p550_p4)
}
   0xc   :  { %s621_s18 = smov 128   ;;  %s622_s19 = smov 8  }
   0xd   :  { %35 = dma.hbm_to_vmem [thread:$0]  %s674_s1, 4096, %s30_s16, [#allocation6], %s621_s18, %s621_s18, %s622_s19  }
   0xe   :  { %s623_s22 = smov [#allocation2]  }
   0xf   :  { %s17_s23 = sshll.u32 %s623_s22, 4  ;;  %s18_s23 = int_to_ptr.vmem [resolvable:$true] %s17_s23 }
  0x10   :  { %s562_s24 = scalar_lea.vmem %s18_s23, 2048  ;;  %p567_p6 = scmp.lt.s32.totalorder %s18_s23, %s18_s23 }
  0x11   :  { %p563_p5 = scmp.ne.s32.totalorder %s18_s23, %s562_s24  ;;  %p568_p7 = scmp.lt.s32.totalorder %s562_s24, %s562_s24 }
  0x13   :  { %p569_p8 = por %p568_p7, %p567_p6 }
  0x15   :  { %p570_p9 = pnand %p569_p8, %p563_p5 }
  0x17   :  { %573 = shalt.err (!%p570_p9)
}
  0x18   :  { %s624_s25 = smov 512   ;;  %s625_s26 = smov 32  }
  0x19   :  { %23 = dma.hbm_to_vmem [thread:$0]  %s673_s0, 2048, %s18_s23, [#allocation3], %s624_s25, %s624_s25, %s625_s26  }
  0x1a   :  { %s626_s29 = smov [#allocation7]  }
  0x1b   :  { %s43_s30 = sshll.u32 %s626_s29, 4  ;;  %s44_s30 = int_to_ptr.vmem [resolvable:$true] %s43_s30 }
  0x1c   :  { %s582_s1 = scalar_lea.vmem %s44_s30, 256  ;;  %p587_p11 = scmp.lt.s32.totalorder %s44_s30, %s44_s30 }
  0x1d   :  { %p583_p10 = scmp.ne.s32.totalorder %s44_s30, %s582_s1  ;;  %p588_p12 = scmp.lt.s32.totalorder %s582_s1, %s582_s1 }
  0x1f   :  { %p589_p13 = por %p588_p12, %p587_p11 }
  0x21   :  { %p590_p0 = pnand %p589_p13, %p583_p10 }
  0x23   :  { %593 = shalt.err (!%p590_p0)
}
  0x24   :  { %49 = dma.hbm_to_vmem [thread:$0]  %s676_s3, 256, %s44_s30, [#allocation6], %s621_s18, %s621_s18, %s622_s19  }
  0x25   :  { %614 = dma.done.wait [#allocation3], 2048  }
  0x26   :  { %615 = vsyncadd [#allocation3], 4294965248 }
  0x27   :  { %616 = dma.done.wait [#allocation6], 4352  }
  0x28   :  { %617 = vsyncadd [#allocation6], 4294962944  ;;  %v627_v0 = vmov 0.0   ;;  %v74_v1 = vld [vmem:[#allocation2 + $0x68] sm:$0xff]  ;;  %v73_v2 = vld [vmem:[#allocation2 + $0x60] sm:$0xff]  ;;  %vm77_vm0 = vcmask 261120  }
  0x29   :  { %148 = vmatprep.mubr.f32.mxu1 %v627_v0  ;;  %v70_v3 = vld [vmem:[#allocation2 + $0x48] sm:$0xff]  ;;  %108 = vmatprep.subr.mxu1 %v74_v1  ;;  %v69_v4 = vld [vmem:[#allocation2 + $0x40] sm:$0xff]  ;;  %v76_v10 = vld [vmem:[#allocation2 + $0x78] sm:$0xff]  ;;  %vm377_vm1 = vcmask 1041409   ;;  %s628_s7 = smov [#allocation8]  }
  0x2a   :  { %109 = vmatpush1.msra.mxu1 %v73_v2  ;;  %v66_v5 = vld [vmem:[#allocation2 + $0x28] sm:$0xff]  ;;  %v65_v6 = vld [vmem:[#allocation2 + $0x20] sm:$0xff]  ;;  %v75_v11 = vld [vmem:[#allocation2 + $0x70] sm:$0xff]  ;;  %s459_s8 = sshll.u32 %s628_s7, 4  ;;  %s460_s8 = int_to_ptr.vmem [resolvable:$true] %s459_s8 }
  0x2b   :  { %110 = vmatprep.subr.mxu1 %v70_v3  ;;  %v62_v7 = vld [vmem:[#allocation2 + $0x8] sm:$0xff]  ;;  %v61_v8 = vld [vmem:[#allocation2] sm:$0xff]  ;;  %v72_v12 = vld [vmem:[#allocation2 + $0x58] sm:$0xff]  ;;  %s594_s9 = scalar_lea.vmem %s460_s8, 32  ;;  %p599_p2 = scmp.lt.s32.totalorder %s460_s8, %s460_s8 }
  0x2c   :  { %111 = vmatpush1.msra.mxu1 %v69_v4  ;;  %v59_v9 = vld [vmem:[#allocation7] sm:$0xff]  ;;  %v71_v13 = vld [vmem:[#allocation2 + $0x50] sm:$0xff]  ;;  %v60_v14 = vld [vmem:[#allocation7 + $0x8] sm:$0xff]  ;;  %p595_p1 = scmp.ne.s32.totalorder %s460_s8, %s594_s9  ;;  %p600_p3 = scmp.lt.s32.totalorder %s594_s9, %s594_s9 }
  0x2d   :  { %112 = vmatprep.subr.mxu1 %v66_v5  ;;  %v68_v15 = vld [vmem:[#allocation2 + $0x38] sm:$0xff]  ;;  %v67_v16 = vld [vmem:[#allocation2 + $0x30] sm:$0xff]  ;;  %v363_v23 = vld [vmem:[#allocation5 + $0xe8] sm:$0xff] }
  0x2e   :  { %113 = vmatpush1.msra.mxu1 %v65_v6  ;;  %v64_v17 = vld [vmem:[#allocation2 + $0x18] sm:$0xff]  ;;  %v63_v18 = vld [vmem:[#allocation2 + $0x10] sm:$0xff]  ;;  %v347_v24 = vld [vmem:[#allocation5 + $0x68] sm:$0xff]  ;;  %p601_p4 = por %p600_p3, %p599_p2 }
  0x2f   :  { %114 = vmatprep.subr.mxu1 %v62_v7  ;;  %v365_v19 = vld [vmem:[#allocation5 + $0xf8] sm:$0xff]  ;;  %v364_v21 = vld [vmem:[#allocation5 + $0xf0] sm:$0xff]  ;;  %v362_v25 = vld [vmem:[#allocation5 + $0xe0] sm:$0xff] }
  0x30   :  { %115 = vmatpush1.msra.mxu1 %v61_v8  ;;  %v349_v20 = vld [vmem:[#allocation5 + $0x78] sm:$0xff]  ;;  %474 = vmatprep.subr.mxu0 %v365_v19  ;;  %v348_v22 = vld [vmem:[#allocation5 + $0x70] sm:$0xff]  ;;  %v346_v26 = vld [vmem:[#allocation5 + $0x60] sm:$0xff]  ;;  %p602_p5 = pnand %p601_p4, %p595_p1 }
  0x31   :  { %469 = vmatmul.mubr.msk.f32.vlgmr.msra.gmra.mxu1 %vm77_vm0, %v59_v9  ;;  %185 = vmatprep.subr.mxu1 %v76_v10  ;;  %v361_v27 = vld [vmem:[#allocation5 + $0xd8] sm:$0xff]  ;;  %v360_v29 = vld [vmem:[#allocation5 + $0xd0] sm:$0xff]  ;;  %v359_v31 = vld [vmem:[#allocation5 + $0xc8] sm:$0xff] }
  0x32   :  { %186 = vmatpush1.msra.mxu1 %v75_v11  ;;  %154 = vmatprep.mubr.f32.mxu1 %v627_v0  ;;  %v345_v28 = vld [vmem:[#allocation5 + $0x58] sm:$0xff]  ;;  %v344_v30 = vld [vmem:[#allocation5 + $0x50] sm:$0xff]  ;;  %v343_v32 = vld [vmem:[#allocation5 + $0x48] sm:$0xff] }
  0x33   :  { %187 = vmatprep.subr.mxu1 %v72_v12  ;;  %475 = vmatpush3.msra.mxu0 %v349_v20  ;;  %v358_v33 = vld [vmem:[#allocation5 + $0xc0] sm:$0xff]  ;;  %v357_v35 = vld [vmem:[#allocation5 + $0xb8] sm:$0xff]  ;;  %v356_v37 = vld [vmem:[#allocation5 + $0xb0] sm:$0xff] }
  0x34   :  { %188 = vmatpush1.msra.mxu1 %v71_v13  ;;  %476 = vmatprep.subr.mxu0 %v364_v21  ;;  %v342_v34 = vld [vmem:[#allocation5 + $0x40] sm:$0xff]  ;;  %v341_v36 = vld [vmem:[#allocation5 + $0x38] sm:$0xff]  ;;  %v340_v38 = vld [vmem:[#allocation5 + $0x30] sm:$0xff] }
  0x35   :  { %470 = vmatmul.mubr.msk.f32.gmra.mxu1 %vm77_vm0, %v60_v14  ;;  %189 = vmatprep.subr.mxu1 %v68_v15  ;;  %v355_v39 = vld [vmem:[#allocation5 + $0xa8] sm:$0xff]  ;;  %v354_v41 = vld [vmem:[#allocation5 + $0xa0] sm:$0xff]  ;;  %v353_v43 = vld [vmem:[#allocation5 + $0x98] sm:$0xff] }
  0x36   :  { %190 = vmatpush1.msra.mxu1 %v67_v16  ;;  %225 = vmatprep.mubr.f32.mxu1 %v627_v0  ;;  %v339_v40 = vld [vmem:[#allocation5 + $0x28] sm:$0xff]  ;;  %v338_v42 = vld [vmem:[#allocation5 + $0x20] sm:$0xff]  ;;  %v337_v44 = vld [vmem:[#allocation5 + $0x18] sm:$0xff] }
  0x37   :  { %191 = vmatprep.subr.mxu1 %v64_v17  ;;  %477 = vmatpush3.msra.mxu0 %v348_v22  ;;  %v352_v45 = vld [vmem:[#allocation5 + $0x90] sm:$0xff]  ;;  %v351_v47 = vld [vmem:[#allocation5 + $0x88] sm:$0xff]  ;;  %v350_v49 = vld [vmem:[#allocation5 + $0x80] sm:$0xff] }
  0x38   :  { %192 = vmatpush1.msra.mxu1 %v63_v18  ;;  %478 = vmatprep.subr.mxu0 %v363_v23  ;;  %v336_v46 = vld [vmem:[#allocation5 + $0x10] sm:$0xff]  ;;  %v335_v48 = vld [vmem:[#allocation5 + $0x8] sm:$0xff]  ;;  %v334_v50 = vld [vmem:[#allocation5] sm:$0xff] }
  0x39   :  { %471 = vmatmul.mubr.msk.f32.vlgmr.msra.gmra.mxu1 %vm77_vm0, %v59_v9  ;;  %479 = vmatpush3.msra.mxu0 %v347_v24 }
  0x3a   :  { %231 = vmatprep.mubr.f32.mxu1 %v627_v0  ;;  %480 = vmatprep.subr.mxu0 %v362_v25 }
  0x3b   :  { %481 = vmatpush3.msra.mxu0 %v346_v26 }
  0x3c   :  { %482 = vmatprep.subr.mxu0 %v361_v27 }
  0x3d   :  { %472 = vmatmul.mubr.msk.f32.gmra.mxu1 %vm77_vm0, %v60_v14  ;;  %483 = vmatpush3.msra.mxu0 %v345_v28 }
  0x3e   :  { %484 = vmatprep.subr.mxu0 %v360_v29 }
  0x3f   :  { %485 = vmatpush3.msra.mxu0 %v344_v30 }
  0x40   :  { %486 = vmatprep.subr.mxu0 %v359_v31 }
  0x41   :  { %487 = vmatpush3.msra.mxu0 %v343_v32 }
  0x42   :  { %488 = vmatprep.subr.mxu0 %v358_v33 }
  0x43   :  { %489 = vmatpush3.msra.mxu0 %v342_v34 }
  0x44   :  { %490 = vmatprep.subr.mxu0 %v357_v35 }
  0x45   :  { %491 = vmatpush3.msra.mxu0 %v341_v36 }
  0x46   :  { %492 = vmatprep.subr.mxu0 %v356_v37 }
  0x47   :  { %493 = vmatpush3.msra.mxu0 %v340_v38 }
  0x48   :  { %494 = vmatprep.subr.mxu0 %v355_v39 }
  0x49   :  { %495 = vmatpush3.msra.mxu0 %v339_v40 }
  0x4a   :  { %496 = vmatprep.subr.mxu0 %v354_v41 }
  0x4b   :  { %497 = vmatpush3.msra.mxu0 %v338_v42 }
  0x4c   :  { %498 = vmatprep.subr.mxu0 %v353_v43 }
  0x4d   :  { %499 = vmatpush3.msra.mxu0 %v337_v44 }
  0x4e   :  { %500 = vmatprep.subr.mxu0 %v352_v45 }
  0x4f   :  { %501 = vmatpush3.msra.mxu0 %v336_v46 }
  0x50   :  { %502 = vmatprep.subr.mxu0 %v351_v47 }
  0x51   :  { %503 = vmatpush3.msra.mxu0 %v335_v48 }
  0x52   :  { %504 = vmatprep.subr.mxu0 %v350_v49 }
  0x53   :  { %505 = vmatpush3.msra.mxu0 %v334_v50 }
  0xf1   :  { %v150_v51 = vpop.f32.mrf.mxu1 }
  0xf3   :  { %v152_v52 = vpop.f32.mrf.mxu1 }
  0xf5   :  { %v156_v53 = vpop.f32.mrf.mxu1 }
  0xf7   :  { %v158_v54 = vpop.f32.mrf.mxu1 }
  0xf9   :  { %v227_v55 = vpop.f32.mrf.mxu1 }
  0xfa   :  { %v238_v56 = vrot.slane %v227_v55, 4 }
  0xfb   :  { %v229_v57 = vpop.f32.mrf.mxu1 }
  0xfc   :  { %v239_v58 = vmax.f32 %v227_v55, %v238_v56  ;;  %v244_v59 = vrot.slane %v229_v57, 4 }
  0xfd   :  { %v233_v60 = vpop.f32.mrf.mxu1 }
  0xfe   :  { %v240_v61 = vrot.slane %v239_v58, 2  ;;  %v245_v62 = vmax.f32 %v229_v57, %v244_v59  ;;  %v250_v63 = vrot.slane %v233_v60, 4 }
  0xff   :  { %v235_v0 = vpop.f32.mrf.mxu1 }
 0x100   :  { %v241_v1 = vmax.f32 %v239_v58, %v240_v61  ;;  %v246_v2 = vrot.slane %v245_v62, 2  ;;  %v251_v3 = vmax.f32 %v233_v60, %v250_v63  ;;  %v256_v4 = vrot.slane %v235_v0, 4 }
 0x102   :  { %v242_v5 = vrot.slane %v241_v1, 1  ;;  %v247_v6 = vmax.f32 %v245_v62, %v246_v2  ;;  %v252_v7 = vrot.slane %v251_v3, 2  ;;  %v257_v8 = vmax.f32 %v235_v0, %v256_v4 }
 0x104   :  { %v243_v9 = vmax.f32 %v241_v1, %v242_v5  ;;  %v248_v10 = vrot.slane %v247_v6, 1  ;;  %v253_v11 = vmax.f32 %v251_v3, %v252_v7  ;;  %v258_v12 = vrot.slane %v257_v8, 2 }
 0x106   :  { %v262_v13 = vsub.f32 %v227_v55, %v243_v9  ;;  %v249_v14 = vmax.f32 %v247_v6, %v248_v10  ;;  %v254_v15 = vrot.slane %v253_v11, 1  ;;  %v259_v16 = vmax.f32 %v257_v8, %v258_v12 }
 0x108   :  { %v266_v17 = vmul.f32 1.442695, %v262_v13  ;;  %v263_v18 = vsub.f32 %v229_v57, %v249_v14  ;;  %v255_v19 = vmax.f32 %v253_v11, %v254_v15  ;;  %v260_v20 = vrot.slane %v259_v16, 1 }
 0x10a   :  { %518 = vpow2.f32 %v266_v17  ;;  %v268_v21 = vmul.f32 1.442695, %v263_v18  ;;  %v264_v22 = vsub.f32 %v233_v60, %v255_v19  ;;  %v261_v23 = vmax.f32 %v259_v16, %v260_v20 }
 0x10c   :  { %520 = vpow2.f32 %v268_v21  ;;  %v270_v24 = vmul.f32 1.442695, %v264_v22  ;;  %v265_v25 = vsub.f32 %v235_v0, %v261_v23 }
 0x10e   :  { %522 = vpow2.f32 %v270_v24  ;;  %v272_v26 = vmul.f32 1.442695, %v265_v25 }
 0x110   :  { %524 = vpow2.f32 %v272_v26 }
 0x117   :  { %v519_v27 = vpop.eup %518 }
 0x118   :  { %v274_v28 = vrot.slane %v519_v27, 4  ;;  %v298_v44 = vmul.f32 %v519_v27, %v150_v51 }
 0x119   :  { %v521_v29 = vpop.eup %520 }
 0x11a   :  { %v280_v30 = vrot.slane %v521_v29, 4  ;;  %v275_v31 = vadd.f32 %v519_v27, %v274_v28  ;;  %v299_v40 = vmul.f32 %v521_v29, %v152_v52  ;;  %v302_v60 = vrot.slane %v298_v44, 4 }
 0x11b   :  { %v523_v32 = vpop.eup %522 }
 0x11c   :  { %v281_v33 = vadd.f32 %v521_v29, %v280_v30  ;;  %v276_v34 = vrot.slane %v275_v31, 2  ;;  %v286_v35 = vrot.slane %v523_v32, 4  ;;  %v300_v37 = vmul.f32 %v523_v32, %v156_v53  ;;  %v473_v30 = vld [vmem:[%s675_s2] ss:$0 sm:$0xff] }
 0x11d   :  { %v525_v36 = vpop.eup %524  ;;  %v308_v56 = vrot.slane %v299_v40, 4  ;;  %v303_v1 = vadd.f32 %v302_v60, %v298_v44 }
 0x11e   :  { %v282_v38 = vrot.slane %v281_v33, 2  ;;  %v292_v39 = vrot.slane %v525_v36, 4  ;;  %v301_v41 = vmul.f32 %v525_v36, %v158_v54  ;;  %v277_v42 = vadd.f32 %v276_v34, %v275_v31 }
 0x11f   :  { %v287_v43 = vadd.f32 %v523_v32, %v286_v35  ;;  %v314_v49 = vrot.slane %v300_v37, 4  ;;  %v309_v63 = vadd.f32 %v308_v56, %v299_v40  ;;  %v304_v6 = vrot.slane %v303_v1, 2 }
 0x120   :  { %v283_v45 = vadd.f32 %v282_v38, %v281_v33  ;;  %v293_v46 = vadd.f32 %v525_v36, %v292_v39  ;;  %v278_v47 = vrot.slane %v277_v42, 1  ;;  %v320_v57 = vrot.slane %v301_v41, 4 }
 0x121   :  { %v288_v48 = vrot.slane %v287_v43, 2  ;;  %v315_v52 = vadd.f32 %v314_v49, %v300_v37  ;;  %v310_v4 = vrot.slane %v309_v63, 2  ;;  %v305_v10 = vadd.f32 %v304_v6, %v303_v1 }
 0x122   :  { %v284_v50 = vrot.slane %v283_v45, 1  ;;  %v294_v55 = vrot.slane %v293_v46, 2  ;;  %v279_v58 = vadd.f32 %v278_v47, %v277_v42  ;;  %v321_v0 = vadd.f32 %v320_v57, %v301_v41 }
 0x123   :  { %v289_v59 = vadd.f32 %v288_v48, %v287_v43  ;;  %v316_v3 = vrot.slane %v315_v52, 2  ;;  %v311_v8 = vadd.f32 %v310_v4, %v309_v63  ;;  %v306_v14 = vrot.slane %v305_v10, 1 }
 0x124   :  { %v285_v53 = vadd.f32 %v284_v50, %v283_v45  ;;  %v295_v61 = vadd.f32 %v294_v55, %v293_v46  ;;  %526 = vrcp.f32 %v279_v58  ;;  %v322_v5 = vrot.slane %v321_v0, 2 }
 0x125   :  { %v290_v62 = vrot.slane %v289_v59, 1  ;;  %v317_v7 = vadd.f32 %v316_v3, %v315_v52  ;;  %v312_v12 = vrot.slane %v311_v8, 1  ;;  %v307_v22 = vadd.f32 %v306_v14, %v305_v10 }
 0x126   :  { %v296_v54 = vrot.slane %v295_v61, 1  ;;  %528 = vrcp.f32 %v285_v53  ;;  %v323_v9 = vadd.f32 %v322_v5, %v321_v0 }
 0x127   :  { %v291_v51 = vadd.f32 %v290_v62, %v289_v59  ;;  %v318_v11 = vrot.slane %v317_v7, 1  ;;  %v313_v19 = vadd.f32 %v312_v12, %v311_v8 }
 0x128   :  { %v297_v2 = vadd.f32 %v296_v54, %v295_v61  ;;  %v324_v13 = vrot.slane %v323_v9, 1 }
 0x129   :  { %530 = vrcp.f32 %v291_v51  ;;  %v319_v17 = vadd.f32 %v318_v11, %v317_v7 }
 0x12a   :  { %532 = vrcp.f32 %v297_v2  ;;  %v325_v20 = vadd.f32 %v324_v13, %v323_v9 }
 0x131   :  { %v527_v15 = vpop.eup %526 }
 0x132   :  { %v330_v26 = vmul.f32 %v527_v15, %v307_v22 }
 0x133   :  { %v529_v16 = vpop.eup %528 }
 0x134   :  { %v331_v24 = vmul.f32 %v529_v16, %v313_v19 }
 0x136   :  { %v531_v18 = vpop.eup %530 }
 0x137   :  { %v533_v21 = vpop.eup %532  ;;  %v332_v23 = vmul.f32 %v531_v18, %v319_v17 }
 0x138   :  { %v333_v25 = vmul.f32 %v533_v21, %v325_v20 }
 0x139   :  { %v378_v28 = vsel %vm377_vm1, %v332_v23, %v330_v26 }
 0x13a   :  { %v379_v27 = vsel %vm377_vm1, %v333_v25, %v331_v24 }
 0x13b   :  { %446 = vmatprep.mubr.f32.mxu0 %v379_v27 }
 0x13c   :  { %447 = vmatmul.mubr.f32.vlgmr.msra.gmra.mxu0 %v378_v28 }
 0x1fc   :  { %v506_v29 = vpop.f32.mrf.mxu0 }
 0x1fe   :  { %v507_v31 = vpop.f32.mrf.mxu0 }
 0x1ff   :  { %v508_v32 = vadd.f32 %v507_v31, %v506_v29 }
 0x201   :  { %v449_v33 = vadd.f32 %v508_v32, %v473_v30 }
 0x203   :  { %452 = vst [vmem:[#allocation8] sm:$0x3] %v449_v33 }
 0x204   :  { %605 = shalt.err (!%p602_p5)
}
 0x205   :  { %462 = dma.vmem_to_hbm [thread:$0]  %s460_s8, 32, %s677_s4, [#allocation4]  }
 0x206   :  { %618 = dma.done.wait [#allocation4], 32  }
 0x207   :  { %619 = vsyncadd [#allocation4], 4294967264 }
 0x208   :  { %466 = vsyncpa [#allocation3], 1 }
 0x209   :  { %467 = vsyncpa [#allocation6], 1 }
 0x20a   :  { %468 = vsyncpa [#allocation4], 1 }

</bundles_post_ra>
